<compile_context>
chip_gen: v6e
topology: v6e:2x2x1
jax: 0.10.0
libtpu: 0.0.40
codegen_flags: <defaults>
</compile_context>

<pallas_src>
import jax
import jax.numpy as jnp
from jax.experimental import pallas as pl
from jax.experimental.pallas import tpu as pltpu


def _uncond_out_kernel(x_ref, w_ref, p_ref, b_ref, o_ref):
    # x_ref: (C, t_oh, 4, W)   input rows feeding t_oh output rows of one image
    # w_ref: (C, 1, 4, W)      conv weight, kw pattern tiled along W
    # p_ref: (W, OW)           0/1 pooling matrix: folds lane groups of 4 -> OW
    # b_ref: (1,) in SMEM      conv bias
    # o_ref: (t_oh, OW)
    prod = x_ref[...] * w_ref[...]          # VPU elementwise, broadcast over t_oh
    s = prod.sum(axis=0)                    # reduce channels      -> (t_oh, 4, W)
    s = s.sum(axis=1)                       # reduce kh (sublanes) -> (t_oh, W)
    acc = jnp.dot(s, p_ref[...], preferred_element_type=jnp.float32)  # (t_oh, OW)
    o_ref[...] = jax.nn.sigmoid(acc + b_ref[0])


def _pick_row_tile(OH, row_bytes, target_bytes=2 * 1024 * 1024):
    """Pick t_oh (output rows per grid step): ~target_bytes of input per block,
    multiple of 8 (output sublane constraint) unless it covers all of OH."""
    t = max(1, target_bytes // row_bytes)
    if t >= OH:
        return OH
    t = (t // 8) * 8
    if t == 0:
        return OH if OH <= 8 else 8
    return t


def unconditional_output(x, weight, bias):
    """Forward of UnconditionalOutput.

    x: (B, C, H, W); weight: (1, C, 4, 4); bias: (1,).
    Returns sigmoid(conv4x4_stride4(x) + bias).reshape(-1), shape (B*(H//4)*(W//4),).
    """
    B, C, H, W = x.shape
    assert H % 4 == 0 and W % 4 == 0, "kernel_size=4, stride=4 conv needs H, W % 4 == 0"
    assert weight.shape == (1, C, 4, 4)
    OH, OW = H // 4, W // 4

    # Free (contiguous) reshape only -- no transpose, no (M, K) patch matrix in HBM.
    x5 = x.reshape(B, C, OH, 4, W).astype(jnp.float32)          # (B, C, OH, kh, W)

    # Parameter-sized prep (negligible HBM traffic, fetched once by the kernel):
    #   wfull[c, 0, kh, 4*ow + kw] = weight[0, c, kh, kw]
    wfull = jnp.tile(weight.astype(jnp.float32).reshape(C, 1, 4, 4), (1, 1, 1, OW))
    #   pool[j, ow] = 1 if j // 4 == ow else 0
    pool = (jnp.arange(W)[:, None] // 4 == jnp.arange(OW)[None, :]).astype(jnp.float32)
    bias_f = bias.astype(jnp.float32).reshape(1)

    # Tile over output rows: one output row consumes C*4*W input floats.
    row_bytes = C * 4 * W * 4
    t_oh = _pick_row_tile(OH, row_bytes)
    grid = (B, pl.cdiv(OH, t_oh))           # masked tail handles OH % t_oh != 0

    out = pl.pallas_call(
        _uncond_out_kernel,
        out_shape=jax.ShapeDtypeStruct((B, OH, OW), jnp.float32),
        grid=grid,
        in_specs=[
            pl.BlockSpec((None, C, t_oh, 4, W), lambda b, i: (b, 0, i, 0, 0)),
            pl.BlockSpec((C, 1, 4, W), lambda b, i: (0, 0, 0, 0)),
            pl.BlockSpec((W, OW), lambda b, i: (0, 0)),
            pl.BlockSpec(memory_space=pltpu.MemorySpace.SMEM),
        ],
        out_specs=pl.BlockSpec((None, t_oh, OW), lambda b, i: (b, i, 0)),
        compiler_params=pltpu.CompilerParams(
            dimension_semantics=("parallel", "parallel"),
        ),
    )(x5, wfull, pool, bias_f)

    return out.reshape(-1)


def _reference(x, weight, bias):
    # Independent check via XLA conv (NCHW / OIHW), stride 4, no padding.
    y = jax.lax.conv_general_dilated(
        x, weight, window_strides=(4, 4), padding="VALID",
        dimension_numbers=("NCHW", "OIHW", "NCHW"),
    ) + bias.reshape(1, 1, 1, 1)
    return jax.nn.sigmoid(y).reshape(-1)


if __name__ == "__main__":
    key = jax.random.PRNGKey(0)
    kx, kw, kb = jax.random.split(key, 3)

    B, C, H, W = 2, 4, 16, 16
    x = jax.random.normal(kx, (B, C, H, W), dtype=jnp.float32)

    # Deterministic Conv2d(C, 1, kernel_size=4, stride=4) params
    # (PyTorch-style uniform init: bound = 1/sqrt(fan_in) = 1/sqrt(C*4*4)).
    fan_in = C * 4 * 4
    bound = 1.0 / (fan_in ** 0.5)
    weight = jax.random.uniform(kw, (1, C, 4, 4), jnp.float32, -bound, bound)
    bias = jax.random.uniform(kb, (1,), jnp.float32, -bound, bound)

    out = unconditional_output(x, weight, bias)
    out = jax.block_until_ready(out)

    ref = _reference(x, weight, bias)
    assert out.shape == ref.shape == (B * (H // 4) * (W // 4),)
    assert jnp.allclose(out, ref, atol=1e-5, rtol=1e-5), "mismatch vs XLA conv reference"

    print("KERNEL_OK")
</pallas_src>

<mosaic_0001>
module attributes {stable_mosaic.version = 11 : i64} {
  func.func @_uncond_out_kernel(%arg0: i32, %arg1: i32, %arg2: memref<1x4x4x4x16xf32, #tpu.memory_space<vmem>>, %arg3: memref<4x1x4x16xf32, #tpu.memory_space<vmem>>, %arg4: memref<16x4xf32, #tpu.memory_space<vmem>>, %arg5: memref<1xf32, #tpu.memory_space<smem>>, %arg6: memref<1x4x4xf32, #tpu.memory_space<vmem>>) attributes {dimension_semantics = [#tpu.dimension_semantics<parallel>, #tpu.dimension_semantics<parallel>], iteration_bounds = array<i64: 2, 1>, scalar_prefetch = 0 : i64, scratch_operands = 0 : i64, tpu.core_type = #tpu.core_type<tc>, window_params = [{transform_indices = @transform_0, window_bounds = array<i64: 1, 4, 4, 4, 16>}, {pipeline_mode = #tpu.pipeline_mode<synchronous>, transform_indices = @transform_1, window_bounds = array<i64: 4, 1, 4, 16>}, {pipeline_mode = #tpu.pipeline_mode<synchronous>, transform_indices = @transform_2, window_bounds = array<i64: 16, 4>}, {transform_indices = @transform_3, window_bounds = array<i64: 1>}, {transform_indices = @transform_4, window_bounds = array<i64: 1, 4, 4>}]} {
    %c0 = arith.constant 0 : index
    %c0_0 = arith.constant 0 : index
    %c0_1 = arith.constant 0 : index
    %c0_2 = arith.constant 0 : index
    %c0_3 = arith.constant 0 : index
    %0 = vector.load %arg2[%c0, %c0_0, %c0_1, %c0_2, %c0_3] : memref<1x4x4x4x16xf32, #tpu.memory_space<vmem>>, vector<1x4x4x4x16xf32>
    %1 = vector.shape_cast %0 : vector<1x4x4x4x16xf32> to vector<4x4x4x16xf32>
    %c0_4 = arith.constant 0 : index
    %c0_5 = arith.constant 0 : index
    %c0_6 = arith.constant 0 : index
    %c0_7 = arith.constant 0 : index
    %2 = vector.load %arg3[%c0_4, %c0_5, %c0_6, %c0_7] : memref<4x1x4x16xf32, #tpu.memory_space<vmem>>, vector<4x1x4x16xf32>
    %3 = vector.broadcast %2 : vector<4x1x4x16xf32> to vector<4x4x4x16xf32>
    %4 = arith.mulf %1, %3 : vector<4x4x4x16xf32>
    %cst = arith.constant dense<0.000000e+00> : vector<4x4x16xf32>
    %5 = vector.multi_reduction <add>, %4, %cst [0] : vector<4x4x4x16xf32> to vector<4x4x16xf32>
    %cst_8 = arith.constant dense<0.000000e+00> : vector<4x16xf32>
    %6 = vector.multi_reduction <add>, %5, %cst_8 [1] : vector<4x4x16xf32> to vector<4x16xf32>
    %c0_9 = arith.constant 0 : index
    %c0_10 = arith.constant 0 : index
    %7 = vector.load %arg4[%c0_9, %c0_10] : memref<16x4xf32, #tpu.memory_space<vmem>>, vector<16x4xf32>
    %cst_11 = arith.constant dense<0.000000e+00> : vector<4x4xf32>
    %8 = tpu.matmul %6, %7, %cst_11 {dimension_numbers = #tpu.dot_dimension_numbers<[1], [0], [0], [1], [0, 0, 1, 1], [], []>} : vector<4x16xf32>, vector<16x4xf32>, vector<4x4xf32> -> vector<4x4xf32>
    %c0_12 = arith.constant 0 : index
    %9 = memref.load %arg5[%c0_12] : memref<1xf32, #tpu.memory_space<smem>>
    %10 = vector.broadcast %9 : f32 to vector<4x4xf32>
    %11 = arith.addf %8, %10 : vector<4x4xf32>
    %12 = arith.negf %11 : vector<4x4xf32>
    %13 = math.exp %12 : vector<4x4xf32>
    %cst_13 = arith.constant 1.000000e+00 : f32
    %14 = vector.broadcast %cst_13 : f32 to vector<4x4xf32>
    %15 = arith.addf %14, %13 : vector<4x4xf32>
    %16 = arith.divf %14, %15 : vector<4x4xf32>
    %c0_14 = arith.constant 0 : index
    %c0_15 = arith.constant 0 : index
    %c0_16 = arith.constant 0 : index
    %17 = vector.load %arg6[%c0_14, %c0_15, %c0_16] : memref<1x4x4xf32, #tpu.memory_space<vmem>>, vector<1x4x4xf32>
    %18 = vector.shape_cast %17 : vector<1x4x4xf32> to vector<4x4xf32>
    %19 = vector.shape_cast %16 : vector<4x4xf32> to vector<1x4x4xf32>
    tpu.vector_store %arg6[%c0_14, %c0_15, %c0_16], %19 {strides = array<i32>} : memref<1x4x4xf32, #tpu.memory_space<vmem>>, vector<1x4x4xf32>,
    return
  }
  func.func @transform_0(%arg0: i32, %arg1: i32) -> (i32, i32, i32, i32, i32) {
    %c0_i32 = arith.constant 0 : i32
    %c0_i32_0 = arith.constant 0 : i32
    %c0_i32_1 = arith.constant 0 : i32
    %c0_i32_2 = arith.constant 0 : i32
    return %arg0, %c0_i32, %arg1, %c0_i32_0, %c0_i32_1 : i32, i32, i32, i32, i32
  }
  func.func @transform_1(%arg0: i32, %arg1: i32) -> (i32, i32, i32, i32) {
    %c0_i32 = arith.constant 0 : i32
    %c0_i32_0 = arith.constant 0 : i32
    %c0_i32_1 = arith.constant 0 : i32
    %c0_i32_2 = arith.constant 0 : i32
    %c0_i32_3 = arith.constant 0 : i32
    return %c0_i32, %c0_i32_0, %c0_i32_1, %c0_i32_2 : i32, i32, i32, i32
  }
  func.func @transform_2(%arg0: i32, %arg1: i32) -> (i32, i32) {
    %c0_i32 = arith.constant 0 : i32
    %c0_i32_0 = arith.constant 0 : i32
    %c0_i32_1 = arith.constant 0 : i32
    return %c0_i32, %c0_i32_0 : i32, i32
  }
  func.func @transform_3(%arg0: i32, %arg1: i32) -> i32 {
    %c0_i32 = arith.constant 0 : i32
    %c0_i32_0 = arith.constant 0 : i32
    return %c0_i32 : i32
  }
  func.func @transform_4(%arg0: i32, %arg1: i32) -> (i32, i32, i32) {
    %c0_i32 = arith.constant 0 : i32
    %c0_i32_0 = arith.constant 0 : i32
    return %arg0, %arg1, %c0_i32 : i32, i32, i32
  }
}

</mosaic_0001>

<bundles_post_ra>
// kernel: tpu_custom_call.1
= control target key start
LH: loop header
LB: loop body
LE: loop exit
PB: predicated region body
PF: predicated region fallthrough
CT: control target
= control target key end

     0   :  { %s957_s0 = inlined_call_operand.hbm [shape: f32[2,4,4,4,16], index: 0, kind: input, shape index: {}]   ;;  %s958_s1 = inlined_call_operand.vmem [shape: f32[4,1,4,16], index: 1, kind: input, shape index: {}]   ;;  %s959_s2 = inlined_call_operand.vmem [shape: f32[16,4], index: 2, kind: input, shape index: {}]   ;;  %s960_s3 = inlined_call_operand.<no memory space> [shape: f32[1], index: 3, kind: input, shape index: {}]   ;;  %s961_s4 = inlined_call_operand.hbm [shape: f32[2,4,4], index: 4, kind: output, shape index: {}]  }
   0x1   :  { %9 = sst [smem:[#allocation2]] %s960_s3 }
   0x2   :  { %10 = vsyncpa [#allocation4], 0 }
   0x3   :  { %12 = vsyncpa [#allocation4 + $0x1], 0 }
   0x4   :  { %13 = vsyncpa [#allocation5], 0 }
   0x5   :  { %15 = vsyncpa [#allocation5 + $0x1], 0  ;;  %s762_s17 = smov 0   ;;  %s764_s18 = smov 0  }
   0x6   :  { %s766_s19 = smov 0   ;;  %s768_s20 = smov 0  }
   0x7   :  { %s770_s21 = smov 0   ;;  %s772_s22 = smov 0  }
   0x8 LB: > { %s521_s3 = sadd.s32 4294967295, %s726_s22   ;;  %s522_s23 = sadd.s32 4294967294, %s726_s22   ;;  %s726_s22 = sphi %s772_s22, %s21_s22   ;;  %s722_s21 = sphi %s770_s21, %s972_s21   ;;  %s718_s20 = sphi %s768_s20, %s971_s20   ;;  %s714_s19 = sphi %s766_s19, %s970_s19   ;;  %s710_s18 = sphi %s764_s18, %s969_s18   ;;  %s706_s17 = sphi %s762_s17, %s968_s17  }
   0x9   : > { %s33_s24 = sadd.s32 1, %s722_s21  ;;  %s42_s25 = sadd.s32 1, %s714_s19 }
   0xa   : > { %p35_p0 = scmp.ge.s32.totalorder %s33_s24, 2  ;;  %p49_p1 = scmp.ne.s32.totalorder %s714_s19, %s710_s18 }
   0xb   : > { %p50_p2 = scmp.eq.s32.totalorder %s726_s22, 0  ;;  %p55_p3 = scmp.ne.s32.totalorder %s710_s18, %s706_s17 }
   0xc   : > { %s974_s24 = smov (%p35_p0, %s33_s24), 0  ;;  %p56_p5 = scmp.eq.s32.totalorder %s521_s3, 0 }
   0xd   : > { %p803_p4 = por %p50_p2, %p49_p1  ;;  %s37_s27 = ssub.s32 %s722_s21, %s974_s24 }
   0xe   : > { %p144_p6 = scmp.eq.s32.totalorder %s521_s3, 1  ;;  %p40_p7 = scmp.eq.s32.totalorder %s37_s27, 0 }
   0xf   : > { %p809_p8 = por %p56_p5, %p55_p3  ;;  %p150_p10 = scmp.eq.s32.totalorder %s522_s23, 1 }
  0x10   : > { %p813_p9 = por %p144_p6, %p49_p1  ;;  %p560_p13 = scmp.lt.s32.totalorder %s726_s22, 2 }
  0x11   : > { %s818_s30 = scalar_select %p40_p7, %s714_s19, %s42_s25  }
  0x12   : > { %p820_p11 = por %p150_p10, %p55_p3  ;;  %s179_s6 = sand.u32 1, %s714_s19  }
  0x13   : > { %s525_s7 = sshll.u32 %s179_s6, 6  ;;  %s537_s8 = sshll.u32 %s722_s21, 10 }
  0x14   : > { %s191_s11 = scalar_lea.hbm %s957_s0, %s537_s8  ;;  %s183_s12 = scalar_lea.vmem [#allocation3], %s525_s7 }
  0x15   : > { %s192_s13 = sshll.u32 %s183_s12, 4  ;;  %p833_p0 = pnand %p560_p13, %p803_p4  ;;  %s193_s13 = int_to_ptr.vmem [resolvable:$true] %s192_s13 }
  0x16   : > { %p528_p1 = scmp.ge.s32.totalorder %s726_s22, 1  ;;  %s180_s15 = scalar_lea.sflag [#allocation4], %s179_s6 }
  0x17   : > { %p620_p2 = pneg %p833_p0  ;;  %s631_s16 = scalar_lea.vmem %s193_s13, 1024 }
  0x18   : > { %p632_p3 = scmp.ne.s32.totalorder %s193_s13, %s631_s16  ;;  %s728_s3 = smov [#allocation3]  }
  0x19   : > { %s636_s23 = sshll.u32 %s728_s3, 4  ;;  %s637_s23 = int_to_ptr.vmem [resolvable:$false] %s636_s23 }
  0x1a   : > { %p634_p5 = pnand %p632_p3, %p620_p2  ;;  %s638_s25 = scalar_lea.vmem %s637_s23, 2048 }
  0x1b   : > { %p639_p7 = scmp.lt.s32.totalorder %s193_s13, %s637_s23  ;;  %p640_p10 = scmp.lt.s32.totalorder %s638_s25, %s631_s16 }
  0x1c   : > { %p635_p6 = pneg %p634_p5 }
  0x1d   : > { %p641_p12 = por %p640_p10, %p639_p7 }
  0x1f   : > { %p642_p4 = pnand %p641_p12, %p635_p6 }
  0x21   : > { %645 = shalt.err (!%p642_p4)
}
  0x22   : > { %s729_s26 = smov 64   ;;  %s730_s27 = smov 4  }
  0x23   : > { %555 = dma.hbm_to_vmem [thread:$0]  (!%p833_p0), %s191_s11, 1024, %s193_s13, %s180_s15, %s729_s26, %s729_s26, %s730_s27  }
  0x24   : > { %p200_p13 = scmp.lt.s32.totalorder %s726_s22, 3 }
  0x26   : > { %p201_p2 = pnand %p528_p1, %p200_p13 }
  0x27   : > { %s846_s6 = sand.u32 (!%p201_p2), 1, %s710_s18  }
  0x28   : > { %204 = sbr.rel (%p201_p2) target bundleno = 321 (0x141), region = 36  ;;  %s529_s7 = sshll.u32 (!%p201_p2), %s846_s6, 6 }
  0x29   : > { %s207_s8 = scalar_lea.sflag (!%p201_p2), [#allocation4], %s846_s6  ;;  %s850_s9 = scalar_lea.vmem (!%p201_p2), [#allocation3], %s529_s7 }
  0x2d   : > { %697 = dma.done.wait (%p809_p8), %s207_s8, 1024  }
  0x2e   : > { %699 = vsyncadd (%p809_p8), %s207_s8, 4294966272  ;;  %v731_v0 = vmov 0.0   ;;  %vm732_vm0 = vmmov 0   ;;  %v330_v1 = vld [vmem:[%s959_s2 + $0x8] sm:$0xff]  ;;  %v329_v2 = vld [vmem:[%s959_s2] sm:$0xff]  ;;  %vm272_vm1 = vcmask 125952  }
  0x2f   : > { %541 = vmatprep.subr.mxu0 %v731_v0  ;;  %545 = vmatprep.mubr.msk.f32.mxu0 %vm732_vm0, %v731_v0  ;;  %v236_v3 = vld [vmem:[%s850_s9] sm:$0xf]  ;;  %v237_v4 = vld [vmem:[%s850_s9 + $0x4] sm:$0xf]  ;;  %v238_v5 = vld [vmem:[%s850_s9 + $0x8] sm:$0xf] }
  0x30   : > { %542 = vmatpush3.msra.mxu0 %v330_v1  ;;  %v239_v6 = vld [vmem:[%s850_s9 + $0xc] sm:$0xf]  ;;  %v240_v7 = vld [vmem:[%s850_s9 + $0x10] sm:$0xf]  ;;  %v241_v8 = vld [vmem:[%s850_s9 + $0x14] sm:$0xf] }
  0x31   : > { %543 = vmatprep.subr.mxu0 %v731_v0  ;;  %v242_v9 = vld [vmem:[%s850_s9 + $0x18] sm:$0xf]  ;;  %v243_v10 = vld [vmem:[%s850_s9 + $0x1c] sm:$0xf]  ;;  %v244_v11 = vld [vmem:[%s850_s9 + $0x20] sm:$0xf] }
  0x32   : > { %544 = vmatpush3.msra.mxu0 %v329_v2  ;;  %v245_v12 = vld [vmem:[%s850_s9 + $0x24] sm:$0xf]  ;;  %v246_v13 = vld [vmem:[%s850_s9 + $0x28] sm:$0xf]  ;;  %v247_v14 = vld [vmem:[%s850_s9 + $0x2c] sm:$0xf] }
  0x33   : > { %v248_v15 = vld [vmem:[%s850_s9 + $0x30] sm:$0xf]  ;;  %v249_v16 = vld [vmem:[%s850_s9 + $0x34] sm:$0xf]  ;;  %v252_v17 = vld [vmem:[%s958_s1] sm:$0xf] }
  0x34   : > { %v253_v18 = vld [vmem:[%s958_s1 + $0x4] sm:$0xf]  ;;  %v254_v19 = vld [vmem:[%s958_s1 + $0x8] sm:$0xf]  ;;  %v250_v20 = vld [vmem:[%s850_s9 + $0x38] sm:$0xf]  ;;  %v256_v23 = vmul.f32 %v252_v17, %v236_v3  ;;  %v257_v24 = vmul.f32 %v252_v17, %v237_v4  ;;  %v258_v25 = vmul.f32 %v252_v17, %v238_v5  ;;  %v259_v26 = vmul.f32 %v252_v17, %v239_v6 }
  0x35   : > { %v251_v21 = vld [vmem:[%s850_s9 + $0x3c] sm:$0xf]  ;;  %v255_v22 = vld [vmem:[%s958_s1 + $0xc] sm:$0xf]  ;;  %v260_v27 = vmul.f32 %v253_v18, %v240_v7  ;;  %v261_v28 = vmul.f32 %v253_v18, %v241_v8  ;;  %v262_v29 = vmul.f32 %v253_v18, %v242_v9  ;;  %v263_v30 = vmul.f32 %v253_v18, %v243_v10  ;;  %s331_s27 = sld [smem:[#allocation2]]  ;;  %s530_s7 = sshll.u32 %s846_s6, 2 }
  0x36   : > { %v264_v31 = vmul.f32 %v254_v19, %v244_v11  ;;  %v265_v32 = vmul.f32 %v254_v19, %v245_v12  ;;  %v266_v33 = vmul.f32 %v254_v19, %v246_v13  ;;  %v267_v34 = vmul.f32 %v254_v19, %v247_v14  ;;  %s534_s8 = sshll.u32 %s718_s20, 6  ;;  %s234_s9 = scalar_lea.vmem [#allocation6], %s530_s7 }
  0x37   : > { %v268_v35 = vmul.f32 %v255_v22, %v248_v15  ;;  %v269_v36 = vmul.f32 %v255_v22, %v249_v16  ;;  %v270_v37 = vmul.f32 %v255_v22, %v250_v20  ;;  %v271_v38 = vmul.f32 %v255_v22, %v251_v21  ;;  %s439_s10 = sshll.u32 %s234_s9, 4  ;;  %s915_s12 = scalar_lea.hbm %s961_s4, %s534_s8  ;;  %s440_s10 = int_to_ptr.vmem [resolvable:$true] %s439_s10 }
  0x38   : > { %v273_v39 = vsel %vm272_vm1, %v256_v23, 0.0  ;;  %v274_v40 = vsel %vm272_vm1, %v260_v27, 0.0  ;;  %v276_v41 = vsel %vm272_vm1, %v264_v31, 0.0  ;;  %v280_v42 = vsel %vm272_vm1, %v257_v24, 0.0  ;;  %s425_s13 = scalar_lea.sflag [#allocation5], %s846_s6  ;;  %s646_s14 = scalar_lea.vmem %s440_s10, 64 }
  0x39   : > { %v275_v43 = vadd.f32 %v274_v40, %v273_v39  ;;  %v278_v44 = vsel %vm272_vm1, %v268_v35, 0.0  ;;  %v281_v45 = vsel %vm272_vm1, %v261_v28, 0.0  ;;  %v283_v46 = vsel %vm272_vm1, %v265_v32, 0.0  ;;  %p647_p8 = scmp.ne.s32.totalorder %s440_s10, %s646_s14  ;;  %s733_s15 = smov [#allocation6]  }
  0x3a   : > { %v282_v47 = vadd.f32 %v281_v45, %v280_v42  ;;  %v285_v48 = vsel %vm272_vm1, %v269_v36, 0.0  ;;  %v287_v49 = vsel %vm272_vm1, %v258_v25, 0.0  ;;  %v288_v50 = vsel %vm272_vm1, %v262_v29, 0.0  ;;  %s650_s16 = sshll.u32 %s733_s15, 4  ;;  %s651_s16 = int_to_ptr.vmem [resolvable:$false] %s650_s16 }
  0x3b   : > { %v277_v51 = vadd.f32 %v276_v41, %v275_v43  ;;  %v289_v52 = vadd.f32 %v288_v50, %v287_v49  ;;  %v290_v53 = vsel %vm272_vm1, %v266_v33, 0.0  ;;  %v292_v54 = vsel %vm272_vm1, %v270_v37, 0.0  ;;  %p648_p12 = pnand %p647_p8, %p813_p9  ;;  %s652_s20 = scalar_lea.vmem %s651_s16, 128 }
  0x3c   : > { %v284_v55 = vadd.f32 %v283_v46, %v282_v47  ;;  %v294_v56 = vsel %vm272_vm1, %v259_v26, 0.0  ;;  %v295_v57 = vsel %vm272_vm1, %v263_v30, 0.0  ;;  %v297_v58 = vsel %vm272_vm1, %v267_v34, 0.0  ;;  %p653_p1 = scmp.lt.s32.totalorder %s440_s10, %s651_s16  ;;  %p654_p3 = scmp.lt.s32.totalorder %s652_s20, %s646_s14 }
  0x3d   : > { %v279_v59 = vadd.f32 %v278_v44, %v277_v51  ;;  %v291_v60 = vadd.f32 %v290_v53, %v289_v52  ;;  %v296_v61 = vadd.f32 %v295_v57, %v294_v56  ;;  %v299_v63 = vsel %vm272_vm1, %v271_v38, 0.0  ;;  %p649_p0 = pneg %p648_p12 }
  0x3e   : > { %v286_v62 = vadd.f32 %v285_v48, %v284_v55  ;;  %vm337_vm2 = vcmask 1041409   ;;  %vm339_vm3 = vcmask 1042434   ;;  %vm341_vm4 = vcmask 1043459   ;;  %p655_p5 = por %p654_p3, %p653_p1 }
  0x3f   : > { %v293_v0 = vadd.f32 %v292_v54, %v291_v60  ;;  %v298_v1 = vadd.f32 %v297_v58, %v296_v61  ;;  %v301_v2 = vsel %vm272_vm1, %v279_v59, 0.0  ;;  %vm343_vm5 = vcmask 130048  }
  0x40   : > { %v302_v3 = vrot.slane %v301_v2, 4  ;;  %v308_v4 = vsel %vm272_vm1, %v286_v62, 0.0  ;;  %v332_v34 = vstv %s331_s27  ;;  %vm422_vm6 = vcmask 27648   ;;  %p656_p6 = pnand %p655_p5, %p649_p0 }
  0x41   : > { %v300_v5 = vadd.f32 %v299_v63, %v298_v1  ;;  %v309_v6 = vrot.slane %v308_v4, 4  ;;  %v315_v7 = vsel %vm272_vm1, %v293_v0, 0.0 }
  0x42   : > { %v303_v8 = vadd.f32 %v302_v3, %v301_v2  ;;  %v316_v9 = vrot.slane %v315_v7, 4 }
  0x43   : > { %v310_v10 = vadd.f32 %v309_v6, %v308_v4  ;;  %v322_v11 = vsel %vm272_vm1, %v300_v5, 0.0 }
  0x44   : > { %v304_v12 = vrot.slane %v303_v8, 2  ;;  %v317_v13 = vadd.f32 %v316_v9, %v315_v7  ;;  %v323_v14 = vrot.slane %v322_v11, 4 }
  0x45   : > { %v311_v15 = vrot.slane %v310_v10, 2 }
  0x46   : > { %v305_v16 = vadd.f32 %v304_v12, %v303_v8  ;;  %v318_v17 = vrot.slane %v317_v13, 2  ;;  %v324_v18 = vadd.f32 %v323_v14, %v322_v11 }
  0x47   : > { %v312_v19 = vadd.f32 %v311_v15, %v310_v10 }
  0x48   : > { %v306_v20 = vrot.slane %v305_v16, 1  ;;  %v319_v21 = vadd.f32 %v318_v17, %v317_v13  ;;  %v325_v22 = vrot.slane %v324_v18, 2 }
  0x49   : > { %v313_v23 = vrot.slane %v312_v19, 1 }
  0x4a   : > { %v307_v24 = vadd.f32 %v306_v20, %v305_v16  ;;  %v320_v25 = vrot.slane %v319_v21, 1  ;;  %v326_v26 = vadd.f32 %v325_v22, %v324_v18 }
  0x4b   : > { %v314_v27 = vadd.f32 %v313_v23, %v312_v19 }
  0x4c   : > { %v321_v28 = vadd.f32 %v320_v25, %v319_v21  ;;  %v327_v29 = vrot.slane %v326_v26, 1 }
  0x4d   : > { %v338_v30 = vsel %vm337_vm2, %v314_v27, %v307_v24 }
  0x4e   : > { %v328_v31 = vadd.f32 %v327_v29, %v326_v26  ;;  %v340_v32 = vsel %vm339_vm3, %v321_v28, %v338_v30 }
  0x50   : > { %v342_v33 = vsel %vm341_vm4, %v328_v31, %v340_v32 }
  0x51   : > { %546 = vmatmul.mubr.msk.f32.vlgmr.msra.gmra.mxu0 %vm343_vm5, %v342_v33 }
 0x111   : > { %v412_v35 = vpop.f32.mrf.mxu0 }
 0x112   : > { %v413_v36 = vadd.f32 %v412_v35, %v332_v34 }
 0x113   : > { %v547_v37 = vpop.f32.mrf.mxu0 }
 0x114   : > { %v532_v38 = vmul.f32 -1.442695, %v413_v36 }
 0x116   : > { %614 = vpow2.f32 %v532_v38 }
 0x123   : > { %v615_v39 = vpop.eup %614 }
 0x124   : > { %v419_v40 = vadd.f32 1.0, %v615_v39 }
 0x126   : > { %616 = vrcp.f32 %v419_v40 }
 0x133   : > { %v617_v41 = vpop.eup %616 }
 0x134   : > { %423 = vst.msk [vmem:[%s234_s9] sm:$0xf] %vm422_vm6, %v617_v41 }
 0x135   : > { %659 = shalt.err (!%p656_p6)
}
 0x136   : > { %s660_s3 = scalar_lea.hbm %s915_s12, 64  ;;  %s664_s25 = scalar_lea.hbm %s961_s4, 128 }
 0x137   : > { %p661_p7 = scmp.ne.s32.totalorder %s915_s12, %s660_s3  ;;  %p665_p13 = scmp.lt.s32.totalorder %s915_s12, %s961_s4 }
 0x138   : > { %p666_p2 = scmp.lt.s32.totalorder %s664_s25, %s660_s3 }
 0x139   : > { %p662_p10 = pnand %p661_p7, %p813_p9 }
 0x13a   : > { %p667_p8 = por %p666_p2, %p665_p13 }
 0x13b   : > { %p663_p4 = pneg %p662_p10 }
 0x13d   : > { %p668_p12 = pnand %p667_p8, %p663_p4 }
 0x13f   : > { %671 = shalt.err (!%p668_p12)
}
 0x140   : > { %550 = dma.vmem_to_hbm [thread:$0]  (%p813_p9), %s440_s10, 64, %s915_s12, %s425_s13  }
 0x141 PF: > { %s451_s7 = sand.u32 1, %s706_s17   ;;  %p967_p0 = scmp.ge.s32.totalorder %s726_s22, 2 }
 0x142   : > { %s452_s8 = scalar_lea.sflag [#allocation5], %s451_s7 }
 0x143   : > { %p557_p1 = pnand %p967_p0, %p820_p11 }
 0x145   : > { %p558_p3 = pneg %p557_p1 }
 0x147   : > { %701 = dma.done.wait (%p558_p3), %s452_s8, 64  }
 0x148   : > { %703 = vsyncadd (%p558_p3), %s452_s8, 4294967232  ;;  %s21_s22 = sadd.s32 1, %s726_s22   ;;  %s968_s17 = smov %s710_s18 }
 0x149   : > { %p18_p5 = scmp.ge.s32.totalorder %s21_s22, 4   ;;  %s969_s18 = smov %s714_s19 }
 0x14a   : > { %s970_s19 = smov %s818_s30  ;;  %s971_s20 = smov %s722_s21 }
 0x14b   : > { %s972_s21 = smov %s974_s24  ;;  %20 = sbr.rel (!%p18_p5) target bundleno = 8 (0x8), region = 81 }
 0x150   :  { %457 = vsyncpa [#allocation4], 1 }
 0x151   :  { %459 = vsyncpa [#allocation4 + $0x1], 1 }
 0x152   :  { %460 = vsyncpa [#allocation5], 1 }
 0x153   :  { %462 = vsyncpa [#allocation5 + $0x1], 1 }

</bundles_post_ra>
